<compile_context>
chip_gen: v6e
topology: v6e:2x2x1
jax: 0.10.0
libtpu: 0.0.40
codegen_flags: <defaults>
</compile_context>

<pallas_src>
import jax
import jax.numpy as jnp
from jax.experimental import pallas as pl
from jax.experimental.pallas import tpu as pltpu


D_IN, D_H1, D_H2, D_OUT = 8, 64, 64, 32


def mlp_kernel(x_ref, w1_ref, b1_ref, w2_ref, b2_ref, w3_ref, b3_ref, o_ref):
    # bf16 operands, f32 accumulation (preferred_element_type), f32 bias add.
    x = x_ref[...].astype(jnp.bfloat16)
    # Layer 1: Linear(8 -> 64) + sigmoid
    h1 = jax.nn.sigmoid(
        jnp.dot(x, w1_ref[...], preferred_element_type=jnp.float32)
        + b1_ref[...])
    # Layer 2: Linear(64 -> 64) + sigmoid
    h2 = jax.nn.sigmoid(
        jnp.dot(h1.astype(jnp.bfloat16), w2_ref[...],
                preferred_element_type=jnp.float32)
        + b2_ref[...])
    # Layer 3: Linear(64 -> 32), no activation (matches PyTorch forward)
    out = (jnp.dot(h2.astype(jnp.bfloat16), w3_ref[...],
                   preferred_element_type=jnp.float32)
           + b3_ref[...])
    o_ref[...] = out.astype(o_ref.dtype)


def prepare_params(params):
    """One-time hoist: (out,in)->(in,out) transpose, bf16 weight cast, bias reshape."""
    return dict(
        w1=params["w1"].T.astype(jnp.bfloat16), b1=params["b1"].reshape(1, -1),
        w2=params["w2"].T.astype(jnp.bfloat16), b2=params["b2"].reshape(1, -1),
        w3=params["w3"].T.astype(jnp.bfloat16), b3=params["b3"].reshape(1, -1),
    )


def _round_up(n, m):
    return ((n + m - 1) // m) * m


def _choose_tile(batch, tile_b):
    """Batch tile: multiple of 8; >=2 grid steps when B > 8 (v7x megacore)."""
    if batch <= 8:
        return 8
    half = _round_up(pl.cdiv(batch, 2), 8)       # cap so grid has >= 2 steps
    tile = min(max(8, int(tile_b)), half)
    return _round_up(tile, 8)


def nn_module_forward(x, prepared, *, tile_b=8192):
    """x: (B, 8) float32.  prepared: output of prepare_params()."""
    B = x.shape[0]
    w1, b1 = prepared["w1"], prepared["b1"]
    w2, b2 = prepared["w2"], prepared["b2"]
    w3, b3 = prepared["w3"], prepared["b3"]

    tile = _choose_tile(B, tile_b)
    grid = (pl.cdiv(B, tile),)   # ragged last block handled by Pallas (no jnp.pad)

    # Batch-tiled input/output; constant index_maps keep weights/biases
    # VMEM-resident across all grid steps.
    x_spec = pl.BlockSpec((tile, D_IN), lambda i: (i, 0))
    o_spec = pl.BlockSpec((tile, D_OUT), lambda i: (i, 0))
    const = lambda shape: pl.BlockSpec(shape, lambda i: (0, 0))

    flops_per_row = 2 * (D_IN * D_H1 + D_H1 * D_H2 + D_H2 * D_OUT)
    weight_bytes = 2 * (D_IN * D_H1 + D_H1 * D_H2 + D_H2 * D_OUT) \
        + 4 * (D_H1 + D_H2 + D_OUT)
    cost = pl.CostEstimate(
        flops=flops_per_row * B,
        transcendentals=(D_H1 + D_H2) * B,                 # exp in the sigmoids
        bytes_accessed=B * 4 * (D_IN + D_OUT) + weight_bytes,
    )

    return pl.pallas_call(
        mlp_kernel,
        out_shape=jax.ShapeDtypeStruct((B, D_OUT), jnp.float32),
        grid_spec=pltpu.PrefetchScalarGridSpec(
            num_scalar_prefetch=0,
            grid=grid,
            in_specs=[
                x_spec,
                const(w1.shape), const(b1.shape),
                const(w2.shape), const(b2.shape),
                const(w3.shape), const(b3.shape),
            ],
            out_specs=o_spec,
        ),
        compiler_params=pltpu.CompilerParams(
            dimension_semantics=("parallel",),
            # Padded, double-buffered x+out footprint ~ tile * 2 KiB (f32);
            # 48 MiB allows tiles up to ~24K rows and stays inside v7x's
            # 64 MiB per-TC VMEM (v5e/v6e have 128 MiB physical).
            vmem_limit_bytes=48 * 1024 * 1024,
        ),
        cost_estimate=cost,
    )(x, w1, b1, w2, b2, w3, b3)


def init_params(key):
    """Deterministic init matching nn.Linear shapes (out_features, in_features)."""
    ks = jax.random.split(key, 8)

    def linear(kw, kb, fan_in, fan_out):
        bound = 1.0 / jnp.sqrt(fan_in)
        w = jax.random.uniform(kw, (fan_out, fan_in), jnp.float32, -bound, bound)
        b = jax.random.uniform(kb, (fan_out,), jnp.float32, -bound, bound)
        return w, b

    w1, b1 = linear(ks[0], ks[1], D_IN, D_H1)
    w2, b2 = linear(ks[2], ks[3], D_H1, D_H2)
    w3, b3 = linear(ks[4], ks[5], D_H2, D_OUT)
    # fc4: Linear(32 -> 1) exists in __init__ but is unused in forward(); omitted.
    return {"w1": w1, "b1": b1, "w2": w2, "b2": b2, "w3": w3, "b3": b3}


def reference_forward(x, p):
    """Pure f32 JAX reference of the PyTorch forward."""
    h1 = jax.nn.sigmoid(x @ p["w1"].T + p["b1"])
    h2 = jax.nn.sigmoid(h1 @ p["w2"].T + p["b2"])
    return h2 @ p["w3"].T + p["b3"]


if __name__ == "__main__":
    key = jax.random.PRNGKey(0)
    k_param, k_x1, k_x2 = jax.random.split(key, 3)

    params = init_params(k_param)
    prepared = prepare_params(params)

    # bf16-operand matmuls (f32 accumulation) => compare against the f32
    # reference with a correspondingly looser tolerance.
    TOL = 3e-2

    # Small shape consistent with the module: batch=8, input_dim=8.
    x_small = jax.random.normal(k_x1, (8, D_IN), dtype=jnp.float32)
    out_small = jax.block_until_ready(nn_module_forward(x_small, prepared))
    ref_small = reference_forward(x_small, params)
    assert out_small.shape == (8, D_OUT)
    assert jnp.allclose(out_small, ref_small, atol=TOL, rtol=TOL), "mismatch (small)"

    # Exercise the multi-step grid + ragged last block (no wrapper pad/slice):
    # B=200 with tile 64 -> grid of 4, last block writes only 8 of 64 rows.
    x_big = jax.random.normal(k_x2, (200, D_IN), dtype=jnp.float32)
    out_big = jax.block_until_ready(nn_module_forward(x_big, prepared, tile_b=64))
    ref_big = reference_forward(x_big, params)
    assert out_big.shape == (200, D_OUT)
    assert jnp.allclose(out_big, ref_big, atol=TOL, rtol=TOL), "mismatch (tiled)"

    print("KERNEL_OK")
</pallas_src>

<mosaic_0001>
module attributes {stable_mosaic.version = 11 : i64} {
  func.func @mlp_kernel(%arg0: i32, %arg1: memref<8x8xf32, #tpu.memory_space<vmem>>, %arg2: memref<8x64xbf16, #tpu.memory_space<vmem>>, %arg3: memref<1x64xf32, #tpu.memory_space<vmem>>, %arg4: memref<64x64xbf16, #tpu.memory_space<vmem>>, %arg5: memref<1x64xf32, #tpu.memory_space<vmem>>, %arg6: memref<64x32xbf16, #tpu.memory_space<vmem>>, %arg7: memref<1x32xf32, #tpu.memory_space<vmem>>, %arg8: memref<8x32xf32, #tpu.memory_space<vmem>>) attributes {dimension_semantics = [#tpu.dimension_semantics<parallel>], iteration_bounds = array<i64: 1>, scalar_prefetch = 0 : i64, scratch_operands = 0 : i64, tpu.core_type = #tpu.core_type<tc>, window_params = [{transform_indices = @transform_0, window_bounds = array<i64: 8, 8>}, {pipeline_mode = #tpu.pipeline_mode<synchronous>, transform_indices = @transform_1, window_bounds = array<i64: 8, 64>}, {pipeline_mode = #tpu.pipeline_mode<synchronous>, transform_indices = @transform_2, window_bounds = array<i64: 1, 64>}, {pipeline_mode = #tpu.pipeline_mode<synchronous>, transform_indices = @transform_3, window_bounds = array<i64: 64, 64>}, {pipeline_mode = #tpu.pipeline_mode<synchronous>, transform_indices = @transform_4, window_bounds = array<i64: 1, 64>}, {pipeline_mode = #tpu.pipeline_mode<synchronous>, transform_indices = @transform_5, window_bounds = array<i64: 64, 32>}, {pipeline_mode = #tpu.pipeline_mode<synchronous>, transform_indices = @transform_6, window_bounds = array<i64: 1, 32>}, {transform_indices = @transform_7, window_bounds = array<i64: 8, 32>}]} {
    %c0 = arith.constant 0 : index
    %c0_0 = arith.constant 0 : index
    %0 = vector.load %arg1[%c0, %c0_0] : memref<8x8xf32, #tpu.memory_space<vmem>>, vector<8x8xf32>
    %1 = arith.truncf %0 : vector<8x8xf32> to vector<8x8xbf16>
    %c0_1 = arith.constant 0 : index
    %c0_2 = arith.constant 0 : index
    %2 = vector.load %arg2[%c0_1, %c0_2] : memref<8x64xbf16, #tpu.memory_space<vmem>>, vector<8x64xbf16>
    %cst = arith.constant dense<0.000000e+00> : vector<8x64xf32>
    %3 = tpu.matmul %1, %2, %cst {dimension_numbers = #tpu.dot_dimension_numbers<[1], [0], [0], [1], [0, 0, 1, 1], [], []>} : vector<8x8xbf16>, vector<8x64xbf16>, vector<8x64xf32> -> vector<8x64xf32>
    %c0_3 = arith.constant 0 : index
    %c0_4 = arith.constant 0 : index
    %4 = vector.load %arg3[%c0_3, %c0_4] : memref<1x64xf32, #tpu.memory_space<vmem>>, vector<1x64xf32>
    %5 = vector.broadcast %4 : vector<1x64xf32> to vector<8x64xf32>
    %6 = arith.addf %3, %5 : vector<8x64xf32>
    %7 = arith.negf %6 : vector<8x64xf32>
    %8 = math.exp %7 : vector<8x64xf32>
    %cst_5 = arith.constant 1.000000e+00 : f32
    %9 = vector.broadcast %cst_5 : f32 to vector<8x64xf32>
    %10 = arith.addf %9, %8 : vector<8x64xf32>
    %11 = arith.divf %9, %10 : vector<8x64xf32>
    %12 = arith.truncf %11 : vector<8x64xf32> to vector<8x64xbf16>
    %c0_6 = arith.constant 0 : index
    %c0_7 = arith.constant 0 : index
    %13 = vector.load %arg4[%c0_6, %c0_7] : memref<64x64xbf16, #tpu.memory_space<vmem>>, vector<64x64xbf16>
    %cst_8 = arith.constant dense<0.000000e+00> : vector<8x64xf32>
    %14 = tpu.matmul %12, %13, %cst_8 {dimension_numbers = #tpu.dot_dimension_numbers<[1], [0], [0], [1], [0, 0, 1, 1], [], []>} : vector<8x64xbf16>, vector<64x64xbf16>, vector<8x64xf32> -> vector<8x64xf32>
    %c0_9 = arith.constant 0 : index
    %c0_10 = arith.constant 0 : index
    %15 = vector.load %arg5[%c0_9, %c0_10] : memref<1x64xf32, #tpu.memory_space<vmem>>, vector<1x64xf32>
    %16 = vector.broadcast %15 : vector<1x64xf32> to vector<8x64xf32>
    %17 = arith.addf %14, %16 : vector<8x64xf32>
    %18 = arith.negf %17 : vector<8x64xf32>
    %19 = math.exp %18 : vector<8x64xf32>
    %cst_11 = arith.constant 1.000000e+00 : f32
    %20 = vector.broadcast %cst_11 : f32 to vector<8x64xf32>
    %21 = arith.addf %20, %19 : vector<8x64xf32>
    %22 = arith.divf %20, %21 : vector<8x64xf32>
    %23 = arith.truncf %22 : vector<8x64xf32> to vector<8x64xbf16>
    %c0_12 = arith.constant 0 : index
    %c0_13 = arith.constant 0 : index
    %24 = vector.load %arg6[%c0_12, %c0_13] : memref<64x32xbf16, #tpu.memory_space<vmem>>, vector<64x32xbf16>
    %cst_14 = arith.constant dense<0.000000e+00> : vector<8x32xf32>
    %25 = tpu.matmul %23, %24, %cst_14 {dimension_numbers = #tpu.dot_dimension_numbers<[1], [0], [0], [1], [0, 0, 1, 1], [], []>} : vector<8x64xbf16>, vector<64x32xbf16>, vector<8x32xf32> -> vector<8x32xf32>
    %c0_15 = arith.constant 0 : index
    %c0_16 = arith.constant 0 : index
    %26 = vector.load %arg7[%c0_15, %c0_16] : memref<1x32xf32, #tpu.memory_space<vmem>>, vector<1x32xf32>
    %27 = vector.broadcast %26 : vector<1x32xf32> to vector<8x32xf32>
    %28 = arith.addf %25, %27 : vector<8x32xf32>
    %c0_17 = arith.constant 0 : index
    %c0_18 = arith.constant 0 : index
    %29 = vector.load %arg8[%c0_17, %c0_18] : memref<8x32xf32, #tpu.memory_space<vmem>>, vector<8x32xf32>
    tpu.vector_store %arg8[%c0_17, %c0_18], %28 {strides = array<i32>} : memref<8x32xf32, #tpu.memory_space<vmem>>, vector<8x32xf32>,
    return
  }
  func.func @transform_0(%arg0: i32) -> (i32, i32) {
    %c0_i32 = arith.constant 0 : i32
    %c0_i32_0 = arith.constant 0 : i32
    return %arg0, %c0_i32 : i32, i32
  }
  func.func @transform_1(%arg0: i32) -> (i32, i32) {
    %c0_i32 = arith.constant 0 : i32
    %c0_i32_0 = arith.constant 0 : i32
    %c0_i32_1 = arith.constant 0 : i32
    return %c0_i32, %c0_i32_0 : i32, i32
  }
  func.func @transform_2(%arg0: i32) -> (i32, i32) {
    %c0_i32 = arith.constant 0 : i32
    %c0_i32_0 = arith.constant 0 : i32
    %c0_i32_1 = arith.constant 0 : i32
    return %c0_i32, %c0_i32_0 : i32, i32
  }
  func.func @transform_3(%arg0: i32) -> (i32, i32) {
    %c0_i32 = arith.constant 0 : i32
    %c0_i32_0 = arith.constant 0 : i32
    %c0_i32_1 = arith.constant 0 : i32
    return %c0_i32, %c0_i32_0 : i32, i32
  }
  func.func @transform_4(%arg0: i32) -> (i32, i32) {
    %c0_i32 = arith.constant 0 : i32
    %c0_i32_0 = arith.constant 0 : i32
    %c0_i32_1 = arith.constant 0 : i32
    return %c0_i32, %c0_i32_0 : i32, i32
  }
  func.func @transform_5(%arg0: i32) -> (i32, i32) {
    %c0_i32 = arith.constant 0 : i32
    %c0_i32_0 = arith.constant 0 : i32
    %c0_i32_1 = arith.constant 0 : i32
    return %c0_i32, %c0_i32_0 : i32, i32
  }
  func.func @transform_6(%arg0: i32) -> (i32, i32) {
    %c0_i32 = arith.constant 0 : i32
    %c0_i32_0 = arith.constant 0 : i32
    %c0_i32_1 = arith.constant 0 : i32
    return %c0_i32, %c0_i32_0 : i32, i32
  }
  func.func @transform_7(%arg0: i32) -> (i32, i32) {
    %c0_i32 = arith.constant 0 : i32
    %c0_i32_0 = arith.constant 0 : i32
    return %arg0, %c0_i32 : i32, i32
  }
}

</mosaic_0001>

<bundles_post_ra>
// kernel: tpu_custom_call.1
= control target key start
LH: loop header
LB: loop body
LE: loop exit
PB: predicated region body
PF: predicated region fallthrough
CT: control target
= control target key end

     0   :  { %vm42_vm0 = vcmask 1043456   ;;  %v380_v2 = vmov 0.0   ;;  %vm381_vm1 = vmmov 0   ;;  %vm38_vm2 = vcmask 64512   ;;  %s467_s0 = inlined_call_operand.vmem [shape: f32[8,8], index: 0, kind: input, shape index: {}]   ;;  %s468_s1 = inlined_call_operand.vmem [shape: bf16[8,64], index: 1, kind: input, shape index: {}]   ;;  %s469_s2 = inlined_call_operand.vmem [shape: f32[1,64], index: 2, kind: input, shape index: {}]   ;;  %s470_s3 = inlined_call_operand.vmem [shape: bf16[64,64], index: 3, kind: input, shape index: {}]   ;;  %s471_s4 = inlined_call_operand.vmem [shape: f32[1,64], index: 4, kind: input, shape index: {}]   ;;  %s472_s5 = inlined_call_operand.vmem [shape: bf16[64,32], index: 5, kind: input, shape index: {}]   ;;  %s473_s6 = inlined_call_operand.vmem [shape: f32[1,32], index: 6, kind: input, shape index: {}]   ;;  %s474_s7 = inlined_call_operand.hbm [shape: f32[8,32], index: 7, kind: output, shape index: {}]  }
   0x1   :  { %v30_v0 = vld [vmem:[%s468_s1] sm:$0xf]  ;;  %309 = vmatprep.subr.bf16.mxu0 %v380_v2  ;;  %311 = vmatprep.mubr.msk.bf16.mxu0 %vm381_vm1, %v380_v2 }
   0x2   :  { %v28_v1 = vld [vmem:[%s467_s0] sm:$0xff]  ;;  %v44_v3 = vsel %vm42_vm0, %v30_v0, 0  ;;  %315 = vmatprep.subr.bf16.mxu1 %v380_v2  ;;  %323 = vmatprep.mubr.msk.bf16.mxu1 %vm381_vm1, %v380_v2 }
   0x3   :  { %v29_v4 = vpack.c.bf16 %v28_v1, %v28_v1  ;;  %310 = vmatpush3.bf16.msra.mxu0 %v44_v3 }
   0x4   :  { %327 = vmatprep.subr.bf16.mxu0 %v380_v2 }
   0x6   :  { %312 = vmatmul.mubr.msk.bf16.vlgmr.msra.gmra.mxu0 %vm38_vm2, %v29_v4 }
   0x7   :  { %335 = vmatprep.mubr.msk.bf16.mxu0 %vm381_vm1, %v380_v2 }
   0x8   :  { %12 = vsyncpa [#allocation3], 0  ;;  %v342_v5 = vld [vmem:[%s470_s3 + $0x18] sm:$0xff]   ;;  %v343_v6 = vld [vmem:[%s470_s3 + $0x10] sm:$0xff]   ;;  %vm132_vm3 = vcmask 523264   ;;  %s382_s22 = smov [#allocation2]  }
   0x9   :  { %316 = vmatpush3.bf16.msra.mxu1 %v342_v5  ;;  %v344_v7 = vld [vmem:[%s470_s3 + $0x8] sm:$0xff]   ;;  %v345_v8 = vld [vmem:[%s470_s3] sm:$0xff]   ;;  %v346_v20 = vld [vmem:[%s472_s5 + $0x18] sm:$0xff]   ;;  %vm265_vm4 = vcmask 261120  }
   0xa   :  { %317 = vmatprep.subr.bf16.mxu1 %v380_v2  ;;  %v281_v9 = vld [vmem:[%s469_s2] ss:$0 sm:$0xff]  ;;  %328 = vmatpush3.bf16.msra.mxu0 %v346_v20  ;;  %v347_v21 = vld [vmem:[%s472_s5 + $0x10] sm:$0xff]   ;;  %v348_v22 = vld [vmem:[%s472_s5 + $0x8] sm:$0xff]  }
   0xb   :  { %329 = vmatprep.subr.bf16.mxu0 %v380_v2  ;;  %v349_v23 = vld [vmem:[%s472_s5] sm:$0xff]  }
   0xc   :  { %v284_v24 = vld [vmem:[%s471_s4] ss:$0 sm:$0xff]  ;;  %s273_s4 = sshll.u32 %s382_s22, 4  ;;  %s274_s4 = int_to_ptr.vmem [resolvable:$true] %s273_s4 }
   0xd   :  { %318 = vmatpush3.bf16.msra.mxu1 %v343_v6  ;;  %v291_v35 = vld [vmem:[%s473_s6] ss:$0 sm:$0xff]  ;;  %s358_s23 = scalar_lea.vmem %s274_s4, 128  ;;  %p363_p1 = scmp.lt.s32.totalorder %s274_s4, %s274_s4 }
   0xe   :  { %319 = vmatprep.subr.bf16.mxu1 %v380_v2  ;;  %330 = vmatpush3.bf16.msra.mxu0 %v347_v21  ;;  %p359_p0 = scmp.ne.s32.totalorder %s274_s4, %s358_s23  ;;  %p364_p2 = scmp.lt.s32.totalorder %s358_s23, %s358_s23 }
   0xf   :  { %331 = vmatprep.subr.bf16.mxu0 %v380_v2 }
  0x10   :  { %p365_p3 = por %p364_p2, %p363_p1 }
  0x11   :  { %320 = vmatpush3.bf16.msra.mxu1 %v344_v7 }
  0x12   :  { %321 = vmatprep.subr.bf16.mxu1 %v380_v2  ;;  %332 = vmatpush3.bf16.msra.mxu0 %v348_v22  ;;  %p366_p4 = pnand %p365_p3, %p359_p0 }
  0x13   :  { %333 = vmatprep.subr.bf16.mxu0 %v380_v2 }
  0x15   :  { %322 = vmatpush3.bf16.msra.mxu1 %v345_v8 }
  0x16   :  { %334 = vmatpush3.bf16.msra.mxu0 %v349_v23 }
  0xc6   :  { %v80_v10 = vpop.f32.mrf.mxu0 }
  0xc7   :  { %v81_v11 = vadd.f32 %v281_v9, %v80_v10 }
  0xc8   :  { %v313_v12 = vpop.f32.mrf.mxu0 }
  0xc9   :  { %v283_v13 = vmul.f32 -1.442695, %v81_v11 }
  0xca   :  { %v83_v14 = vpop.f32.mrf.mxu0 }
  0xcb   :  { %350 = vpow2.f32 %v283_v13 }
  0xcc   :  { %v314_v15 = vpop.f32.mrf.mxu0 }
  0xd8   :  { %v351_v16 = vpop.eup %350 }
  0xd9   :  { %v89_v17 = vadd.f32 1.0, %v351_v16 }
  0xdb   :  { %352 = vrcp.f32 %v89_v17 }
  0xe8   :  { %v353_v18 = vpop.eup %352 }
  0xe9   :  { %v92_v19 = vpack.c.bf16 %v353_v18, %v353_v18 }
  0xeb   :  { %324 = vmatmul.mubr.msk.bf16.vlgmr.msra.gmra.mxu1 %vm132_vm3, %v92_v19 }
 0x1ab   :  { %v170_v25 = vpop.f32.mrf.mxu1 }
 0x1ac   :  { %v171_v26 = vadd.f32 %v284_v24, %v170_v25 }
 0x1ad   :  { %v325_v27 = vpop.f32.mrf.mxu1 }
 0x1ae   :  { %v290_v28 = vmul.f32 -1.442695, %v171_v26 }
 0x1af   :  { %v173_v29 = vpop.f32.mrf.mxu1 }
 0x1b0   :  { %354 = vpow2.f32 %v290_v28 }
 0x1b1   :  { %v326_v30 = vpop.f32.mrf.mxu1 }
 0x1bd   :  { %v355_v31 = vpop.eup %354 }
 0x1be   :  { %v179_v32 = vadd.f32 1.0, %v355_v31 }
 0x1c0   :  { %356 = vrcp.f32 %v179_v32 }
 0x1cd   :  { %v357_v33 = vpop.eup %356 }
 0x1ce   :  { %v182_v34 = vpack.c.bf16 %v357_v33, %v357_v33 }
 0x1d0   :  { %336 = vmatmul.mubr.msk.bf16.vlgmr.msra.gmra.mxu0 %vm132_vm3, %v182_v34 }
 0x290   :  { %v259_v36 = vpop.f32.mrf.mxu0 }
 0x291   :  { %v260_v37 = vadd.f32 %v291_v35, %v259_v36 }
 0x292   :  { %v337_v38 = vpop.f32.mrf.mxu0 }
 0x293   :  { %266 = vst.msk [vmem:[#allocation2] sm:$0xff] %vm265_vm4, %v260_v37 }
 0x294   :  { %v262_v39 = vpop.f32.mrf.mxu0 }
 0x295   :  { %369 = shalt.err (!%p366_p4)
}
 0x296   :  { %276 = dma.vmem_to_hbm [thread:$0]  %s274_s4, 128, %s474_s7, [#allocation3]   ;;  %v338_v40 = vpop.f32.mrf.mxu0 }
 0x297   :  { %378 = dma.done.wait [#allocation3], 128  }
 0x298   :  { %379 = vsyncadd [#allocation3], 4294967168 }
 0x299   :  { %280 = vsyncpa [#allocation3], 1 }

</bundles_post_ra>
